<compile_context>
chip_gen: v7x
topology: tpu7x:2x2x1
jax: 0.10.0
libtpu: 0.0.40
codegen_flags: <defaults>
</compile_context>

<pallas_src>
import functools

import jax
import jax.numpy as jnp
from jax.experimental import pallas as pl
from jax.experimental.pallas import tpu as pltpu

PAD = 16  # common padded feature width (node_in = 16 for this example)


def _softplus(v):
    # Numerically stable softplus: max(x,0) + log1p(exp(-|x|))
    return jnp.maximum(v, 0.0) + jnp.log1p(jnp.exp(-jnp.abs(v)))


def mlp_gaussian_kernel(x_ref, w_ref, s_ref, y_ref):
    """x_ref: (B, PAD); w_ref: (L, PAD, PAD); s_ref: (L, 1, PAD);
    y_ref: (B, 2*node_out) = [params | softplus(sigma_pre)]."""
    n_layers = w_ref.shape[0]
    h = x_ref[...]

    # Hidden layers: Linear (BN already folded into W / shift) -> Softplus
    for i in range(n_layers - 1):
        h = jnp.dot(h, w_ref[i], preferred_element_type=jnp.float32) + s_ref[i]
        h = _softplus(h)

    # Final layer: Linear only (finalActive='None', finalBN=False)
    y = jnp.dot(h, w_ref[n_layers - 1],
                preferred_element_type=jnp.float32) + s_ref[n_layers - 1]

    node_out = y_ref.shape[-1] // 2
    # Apply softplus only on the sigma lanes via a lane-select (no lane shuffle),
    # then write params|sigma as one contiguous block.
    lane = jax.lax.broadcasted_iota(jnp.int32, y.shape, 1)
    out = jnp.where(lane < node_out, y, _softplus(y))
    y_ref[...] = out[:, : 2 * node_out]


def prepare_packed_params(layers, eps=1e-5):
    """One-time parameter prep (NOT on the per-call path).

    Folds eval-mode BatchNorm1d into each hidden Linear:
        bn(xW + b) = x (W * scale) + (beta - mean*scale + b*scale),
        scale = gamma / sqrt(var + eps)
    then zero-pads everything to PAD and stacks:
        w_packed: (L, PAD, PAD)   shift_packed: (L, 1, PAD)
    """
    n_layers = len(layers)
    w_packed = jnp.zeros((n_layers, PAD, PAD), jnp.float32)
    s_packed = jnp.zeros((n_layers, 1, PAD), jnp.float32)
    for i, lyr in enumerate(layers):
        W, b = lyr["W"], lyr["b"]
        if "gamma" in lyr:  # hidden layer with BN
            scale = lyr["gamma"] / jnp.sqrt(lyr["var"] + eps)
            W = W * scale[None, :]
            shift = lyr["beta"] - lyr["mean"] * scale + b * scale
        else:               # final layer: plain Linear
            shift = b
        fi, fo = W.shape
        w_packed = w_packed.at[i, :fi, :fo].set(W)
        s_packed = s_packed.at[i, 0, :fo].set(shift)
    return w_packed, s_packed


@functools.partial(jax.jit, static_argnames=("node_out",))
def mlp_gaussian_forward(x, w_packed, shift_packed, node_out):
    batch, node_in = x.shape
    if node_in < PAD:
        x = jnp.pad(x, ((0, 0), (0, PAD - node_in)))

    n_layers = w_packed.shape[0]
    cost = pl.CostEstimate(
        flops=2 * batch * PAD * PAD * n_layers,
        transcendentals=2 * batch * PAD * n_layers,
        bytes_accessed=4 * (batch * PAD + w_packed.size + shift_packed.size
                            + batch * 2 * node_out),
    )
    vmem = pl.BlockSpec(memory_space=pltpu.MemorySpace.VMEM)
    y = pl.pallas_call(
        mlp_gaussian_kernel,
        out_shape=jax.ShapeDtypeStruct((batch, 2 * node_out), jnp.float32),
        in_specs=[vmem, vmem, vmem],
        out_specs=vmem,
        cost_estimate=cost,
    )(x, w_packed, shift_packed)
    # Free split inside the jitted wrapper.
    return y[:, :node_out], y[:, node_out:]
    # NOTE: for realistic batch sizes, add a 1-D "parallel" batch grid
    # (tile ~512-1024 rows; weights' index_map -> (0,0,0)) and consider bf16
    # matmul operands on v6e/v7x. At batch=8 the kernel is latency-bound.


def init_params(key, nodes):
    """Deterministic init. PyTorch Linear weight is (out, in); we store (in, out)."""
    layers = []
    n_layers = len(nodes) - 1
    keys = jax.random.split(key, 2 * n_layers)
    for i in range(n_layers):
        fan_in, fan_out = nodes[i], nodes[i + 1]
        bound = 1.0 / jnp.sqrt(jnp.float32(fan_in))
        W = jax.random.uniform(keys[2 * i], (fan_in, fan_out),
                               minval=-bound, maxval=bound, dtype=jnp.float32)
        b = jax.random.uniform(keys[2 * i + 1], (fan_out,),
                               minval=-bound, maxval=bound, dtype=jnp.float32)
        lyr = {"W": W, "b": b}
        if i < n_layers - 1:
            # non-trivial (but deterministic) BN parameters / running stats
            idx = jnp.arange(fan_out, dtype=jnp.float32)
            lyr["gamma"] = 1.0 + 0.05 * jnp.cos(idx)
            lyr["beta"] = 0.02 * jnp.sin(idx)
            lyr["mean"] = 0.01 * idx
            lyr["var"] = 1.0 + 0.1 * (idx / jnp.maximum(fan_out - 1, 1))
        layers.append(lyr)
    return layers


def _reference_forward(x, layers, node_out, eps=1e-5):
    """Pure-JAX reference (unfolded BN) for correctness checking."""
    h = x
    for lyr in layers[:-1]:
        z = h @ lyr["W"] + lyr["b"]
        z = (z - lyr["mean"]) * (lyr["gamma"] / jnp.sqrt(lyr["var"] + eps)) + lyr["beta"]
        h = _softplus(z)
    y = h @ layers[-1]["W"] + layers[-1]["b"]
    return y[:, :node_out], _softplus(y[:, node_out:])


if __name__ == "__main__":
    # Small, decreasing node chain (mimics nodeframe.decreasingNode):
    node_in, node_out, hidden_layer = 16, 2, 3
    nodes = [16, 13, 10, 7, node_out * 2]   # node_in -> ... -> node_out*2

    key = jax.random.PRNGKey(0)
    k_x, k_p = jax.random.split(key)
    batch = 8
    x = jax.random.normal(k_x, (batch, node_in), dtype=jnp.float32)

    layers = init_params(k_p, nodes)
    # One-time parameter preparation (BN fold + pad + pack).
    w_packed, shift_packed = prepare_packed_params(layers)

    params, sigma = mlp_gaussian_forward(x, w_packed, shift_packed, node_out)
    params = jax.block_until_ready(params)
    sigma = jax.block_until_ready(sigma)

    assert params.shape == (batch, node_out)
    assert sigma.shape == (batch, node_out)
    assert bool(jnp.all(jnp.isfinite(params))) and bool(jnp.all(sigma > 0))

    # Cross-check against the unfolded pure-JAX reference.
    p_ref, s_ref = _reference_forward(x, layers, node_out)
    assert bool(jnp.allclose(params, p_ref, atol=1e-4, rtol=1e-3))
    assert bool(jnp.allclose(sigma, s_ref, atol=1e-4, rtol=1e-3))

    print("KERNEL_OK")
</pallas_src>

<mosaic_0001>
module attributes {stable_mosaic.version = 11 : i64} {
  func.func @mlp_gaussian_kernel(%arg0: memref<8x16xf32, #tpu.memory_space<vmem>>, %arg1: memref<4x16x16xf32, #tpu.memory_space<vmem>>, %arg2: memref<4x1x16xf32, #tpu.memory_space<vmem>>, %arg3: memref<8x4xf32, #tpu.memory_space<vmem>>) attributes {dimension_semantics = [], scalar_prefetch = 0 : i64, scratch_operands = 0 : i64, tpu.core_type = #tpu.core_type<tc>} {
    %c0 = arith.constant 0 : index
    %c0_0 = arith.constant 0 : index
    %0 = vector.load %arg0[%c0, %c0_0] : memref<8x16xf32, #tpu.memory_space<vmem>>, vector<8x16xf32>
    %c0_1 = arith.constant 0 : index
    %c0_2 = arith.constant 0 : index
    %c0_3 = arith.constant 0 : index
    %1 = vector.load %arg1[%c0_1, %c0_2, %c0_3] : memref<4x16x16xf32, #tpu.memory_space<vmem>>, vector<1x16x16xf32>
    %2 = vector.shape_cast %1 : vector<1x16x16xf32> to vector<16x16xf32>
    %cst = arith.constant dense<0.000000e+00> : vector<8x16xf32>
    %3 = tpu.matmul %0, %2, %cst {dimension_numbers = #tpu.dot_dimension_numbers<[1], [0], [0], [1], [0, 0, 1, 1], [], []>} : vector<8x16xf32>, vector<16x16xf32>, vector<8x16xf32> -> vector<8x16xf32>
    %c0_4 = arith.constant 0 : index
    %c0_5 = arith.constant 0 : index
    %c0_6 = arith.constant 0 : index
    %4 = vector.load %arg2[%c0_4, %c0_5, %c0_6] : memref<4x1x16xf32, #tpu.memory_space<vmem>>, vector<1x1x16xf32>
    %5 = vector.shape_cast %4 : vector<1x1x16xf32> to vector<1x16xf32>
    %6 = vector.broadcast %5 : vector<1x16xf32> to vector<8x16xf32>
    %7 = arith.addf %3, %6 : vector<8x16xf32>
    %cst_7 = arith.constant 0.000000e+00 : f32
    %8 = vector.broadcast %cst_7 : f32 to vector<8x16xf32>
    %9 = arith.maximumf %7, %8 : vector<8x16xf32>
    %10 = math.absf %7 : vector<8x16xf32>
    %cst_8 = arith.constant 0.000000e+00 : f32
    %11 = vector.broadcast %cst_8 : f32 to vector<8x16xf32>
    %12 = arith.subf %11, %10 : vector<8x16xf32>
    %13 = math.exp %12 : vector<8x16xf32>
    %14 = math.log1p %13 : vector<8x16xf32>
    %15 = arith.addf %9, %14 : vector<8x16xf32>
    %c1 = arith.constant 1 : index
    %c0_9 = arith.constant 0 : index
    %c0_10 = arith.constant 0 : index
    %16 = vector.load %arg1[%c1, %c0_9, %c0_10] : memref<4x16x16xf32, #tpu.memory_space<vmem>>, vector<1x16x16xf32>
    %17 = vector.shape_cast %16 : vector<1x16x16xf32> to vector<16x16xf32>
    %cst_11 = arith.constant dense<0.000000e+00> : vector<8x16xf32>
    %18 = tpu.matmul %15, %17, %cst_11 {dimension_numbers = #tpu.dot_dimension_numbers<[1], [0], [0], [1], [0, 0, 1, 1], [], []>} : vector<8x16xf32>, vector<16x16xf32>, vector<8x16xf32> -> vector<8x16xf32>
    %c1_12 = arith.constant 1 : index
    %c0_13 = arith.constant 0 : index
    %c0_14 = arith.constant 0 : index
    %19 = vector.load %arg2[%c1_12, %c0_13, %c0_14] : memref<4x1x16xf32, #tpu.memory_space<vmem>>, vector<1x1x16xf32>
    %20 = vector.shape_cast %19 : vector<1x1x16xf32> to vector<1x16xf32>
    %21 = vector.broadcast %20 : vector<1x16xf32> to vector<8x16xf32>
    %22 = arith.addf %18, %21 : vector<8x16xf32>
    %cst_15 = arith.constant 0.000000e+00 : f32
    %23 = vector.broadcast %cst_15 : f32 to vector<8x16xf32>
    %24 = arith.maximumf %22, %23 : vector<8x16xf32>
    %25 = math.absf %22 : vector<8x16xf32>
    %cst_16 = arith.constant 0.000000e+00 : f32
    %26 = vector.broadcast %cst_16 : f32 to vector<8x16xf32>
    %27 = arith.subf %26, %25 : vector<8x16xf32>
    %28 = math.exp %27 : vector<8x16xf32>
    %29 = math.log1p %28 : vector<8x16xf32>
    %30 = arith.addf %24, %29 : vector<8x16xf32>
    %c2 = arith.constant 2 : index
    %c0_17 = arith.constant 0 : index
    %c0_18 = arith.constant 0 : index
    %31 = vector.load %arg1[%c2, %c0_17, %c0_18] : memref<4x16x16xf32, #tpu.memory_space<vmem>>, vector<1x16x16xf32>
    %32 = vector.shape_cast %31 : vector<1x16x16xf32> to vector<16x16xf32>
    %cst_19 = arith.constant dense<0.000000e+00> : vector<8x16xf32>
    %33 = tpu.matmul %30, %32, %cst_19 {dimension_numbers = #tpu.dot_dimension_numbers<[1], [0], [0], [1], [0, 0, 1, 1], [], []>} : vector<8x16xf32>, vector<16x16xf32>, vector<8x16xf32> -> vector<8x16xf32>
    %c2_20 = arith.constant 2 : index
    %c0_21 = arith.constant 0 : index
    %c0_22 = arith.constant 0 : index
    %34 = vector.load %arg2[%c2_20, %c0_21, %c0_22] : memref<4x1x16xf32, #tpu.memory_space<vmem>>, vector<1x1x16xf32>
    %35 = vector.shape_cast %34 : vector<1x1x16xf32> to vector<1x16xf32>
    %36 = vector.broadcast %35 : vector<1x16xf32> to vector<8x16xf32>
    %37 = arith.addf %33, %36 : vector<8x16xf32>
    %cst_23 = arith.constant 0.000000e+00 : f32
    %38 = vector.broadcast %cst_23 : f32 to vector<8x16xf32>
    %39 = arith.maximumf %37, %38 : vector<8x16xf32>
    %40 = math.absf %37 : vector<8x16xf32>
    %cst_24 = arith.constant 0.000000e+00 : f32
    %41 = vector.broadcast %cst_24 : f32 to vector<8x16xf32>
    %42 = arith.subf %41, %40 : vector<8x16xf32>
    %43 = math.exp %42 : vector<8x16xf32>
    %44 = math.log1p %43 : vector<8x16xf32>
    %45 = arith.addf %39, %44 : vector<8x16xf32>
    %c3 = arith.constant 3 : index
    %c0_25 = arith.constant 0 : index
    %c0_26 = arith.constant 0 : index
    %46 = vector.load %arg1[%c3, %c0_25, %c0_26] : memref<4x16x16xf32, #tpu.memory_space<vmem>>, vector<1x16x16xf32>
    %47 = vector.shape_cast %46 : vector<1x16x16xf32> to vector<16x16xf32>
    %cst_27 = arith.constant dense<0.000000e+00> : vector<8x16xf32>
    %48 = tpu.matmul %45, %47, %cst_27 {dimension_numbers = #tpu.dot_dimension_numbers<[1], [0], [0], [1], [0, 0, 1, 1], [], []>} : vector<8x16xf32>, vector<16x16xf32>, vector<8x16xf32> -> vector<8x16xf32>
    %c3_28 = arith.constant 3 : index
    %c0_29 = arith.constant 0 : index
    %c0_30 = arith.constant 0 : index
    %49 = vector.load %arg2[%c3_28, %c0_29, %c0_30] : memref<4x1x16xf32, #tpu.memory_space<vmem>>, vector<1x1x16xf32>
    %50 = vector.shape_cast %49 : vector<1x1x16xf32> to vector<1x16xf32>
    %51 = vector.broadcast %50 : vector<1x16xf32> to vector<8x16xf32>
    %52 = arith.addf %48, %51 : vector<8x16xf32>
    %53 = tpu.iota {dimensions = array<i32: 1>} : vector<8x16xi32>
    %c2_i32 = arith.constant 2 : i32
    %54 = vector.broadcast %c2_i32 : i32 to vector<8x16xi32>
    %55 = arith.cmpi slt, %53, %54 : vector<8x16xi32>
    %cst_31 = arith.constant 0.000000e+00 : f32
    %56 = vector.broadcast %cst_31 : f32 to vector<8x16xf32>
    %57 = arith.maximumf %52, %56 : vector<8x16xf32>
    %58 = math.absf %52 : vector<8x16xf32>
    %cst_32 = arith.constant 0.000000e+00 : f32
    %59 = vector.broadcast %cst_32 : f32 to vector<8x16xf32>
    %60 = arith.subf %59, %58 : vector<8x16xf32>
    %61 = math.exp %60 : vector<8x16xf32>
    %62 = math.log1p %61 : vector<8x16xf32>
    %63 = arith.addf %57, %62 : vector<8x16xf32>
    %64 = arith.select %55, %52, %63 : vector<8x16xi1>, vector<8x16xf32>
    %65 = vector.extract_strided_slice %64 {offsets = [0, 0], sizes = [8, 4], strides = [1, 1]} : vector<8x16xf32> to vector<8x4xf32>
    %c0_33 = arith.constant 0 : index
    %c0_34 = arith.constant 0 : index
    %66 = vector.load %arg3[%c0_33, %c0_34] : memref<8x4xf32, #tpu.memory_space<vmem>>, vector<8x4xf32>
    tpu.vector_store %arg3[%c0_33, %c0_34], %65 {strides = array<i32>} : memref<8x4xf32, #tpu.memory_space<vmem>>, vector<8x4xf32>,
    return
  }
}

</mosaic_0001>

<bundles_post_ra>
// kernel: mlp_gaussian_forward.1
= control target key start
LH: loop header
LB: loop body
LE: loop exit
PB: predicated region body
PF: predicated region fallthrough
CT: control target
= control target key end

     0   :  { %8 = vsyncpa [#allocation3], 0  ;;  %s663_s0 = inlined_call_operand.hbm [shape: f32[8,16], index: 0, kind: input, shape index: {}]   ;;  %s664_s1 = inlined_call_operand.hbm [shape: f32[4,16,16], index: 1, kind: input, shape index: {}]   ;;  %s665_s2 = inlined_call_operand.vmem [shape: f32[4,1,16], index: 2, kind: input, shape index: {}]   ;;  %s666_s3 = inlined_call_operand.vmem [shape: f32[8,4], index: 3, kind: output, shape index: {}]  }
   0x1   :  { %9 = vsyncpa [#allocation5], 0  ;;  %s582_s12 = smov [#allocation2]   ;;  %s583_s14 = smov [#allocation4]  }
   0x2   :  { %s16_s13 = sshll.u32 %s582_s12, 4  ;;  %s25_s15 = sshll.u32 %s583_s14, 4  ;;  %s17_s13 = int_to_ptr.vmem [resolvable:$true] %s16_s13  ;;  %s609_s15 = int_to_ptr.vmem [resolvable:$true] %s25_s15 }
   0x3   :  { %s534_s18 = scalar_lea.hbm %s663_s0, 128 }
   0x4   :  { %p535_p0 = scmp.ne.s32.totalorder %s663_s0, %s534_s18  ;;  %p538_p1 = scmp.lt.u32.totalorder %s534_s18, %s663_s0 }
   0x6   :  { %p540_p2 = pnand %p538_p1, %p535_p0 }
   0x8   :  { %543 = shalt.err (!%p540_p2)
}
   0x9   :  { %s544_s23 = scalar_lea.vmem %s17_s13, 128  ;;  %p549_p4 = scmp.lt.s32.totalorder %s17_s13, %s17_s13 }
   0xa   :  { %p545_p3 = scmp.ne.s32.totalorder %s17_s13, %s544_s23  ;;  %p550_p5 = scmp.lt.s32.totalorder %s544_s23, %s544_s23 }
   0xc   :  { %p551_p6 = por %p550_p5, %p549_p4 }
   0xe   :  { %p552_p7 = pnand %p551_p6, %p545_p3 }
  0x10   :  { %555 = shalt.err (!%p552_p7)
}
  0x11   :  { %19 = dma.hbm_to_vmem [thread:$0]  %s663_s0, 128, %s17_s13, [#allocation3]  }
  0x12   :  { %s556_s28 = scalar_lea.hbm %s664_s1, 1024 }
  0x13   :  { %p557_p8 = scmp.ne.s32.totalorder %s664_s1, %s556_s28  ;;  %p560_p9 = scmp.lt.u32.totalorder %s556_s28, %s664_s1 }
  0x15   :  { %p562_p10 = pnand %p560_p9, %p557_p8 }
  0x17   :  { %565 = shalt.err (!%p562_p10)
}
  0x18   :  { %s566_s6 = scalar_lea.vmem %s609_s15, 1024  ;;  %p571_p12 = scmp.lt.s32.totalorder %s609_s15, %s609_s15 }
  0x19   :  { %p567_p11 = scmp.ne.s32.totalorder %s609_s15, %s566_s6  ;;  %p572_p13 = scmp.lt.s32.totalorder %s566_s6, %s566_s6 }
  0x1b   :  { %p573_p0 = por %p572_p13, %p571_p12 }
  0x1d   :  { %p574_p1 = pnand %p573_p0, %p567_p11 }
  0x1f   :  { %577 = shalt.err (!%p574_p1)
}
  0x20   :  { %s584_s0 = smov 128   ;;  %s585_s7 = smov 8  }
  0x21   :  { %31 = dma.hbm_to_vmem [thread:$0]  %s664_s1, 1024, %s609_s15, [#allocation5], %s584_s0, %s584_s0, %s585_s7  }
  0x22   :  { %578 = dma.done.wait [#allocation3], 128  }
  0x23   :  { %579 = vsyncadd [#allocation3], 4294967168 }
  0x24   :  { %580 = dma.done.wait [#allocation5], 1024  }
  0x25   :  { %581 = vsyncadd [#allocation5], 4294966272  ;;  %v586_v0 = vmov 0.0|0.0   ;;  %vm587_vm0 = vmmov 0   ;;  %v588_v1 = vmov 0.0   ;;  %v41_v2 = vld [vmem:[#allocation4] sm:$0xff] }
  0x26   :  { %499 = vmatprep.subr.bf16.mxu0 %v586_v0  ;;  %475 = vmatprep.mubr.msk.f32.mxu0 %vm587_vm0, %v588_v1  ;;  %v42_v3 = vld [vmem:[#allocation4 + $0x8] sm:$0xff]  ;;  %v40_v5 = vld [vmem:[#allocation2] sm:$0xff]  ;;  %vm50_vm1 = vcmask 130048   ;;  %v140_v6 = vld [vmem:[#allocation4 + $0x10] sm:$0xff]  ;;  %vm440_vm7 = vcmask 31744  }
  0x27   :  { %502 = vmatprep.subr.bf16.mxu1 %v586_v0  ;;  %482 = vmatprep.mubr.msk.f32.mxu1 %vm587_vm0, %v588_v1  ;;  %v500_v4 = vpack.c.bf16 %v42_v3, %v41_v2  ;;  %v141_v7 = vld [vmem:[#allocation4 + $0x18] sm:$0xff]  ;;  %v448_v9 = vld [vmem:[%s665_s2] ss:$0 sm:$0xff]  ;;  %v240_v28 = vld [vmem:[#allocation4 + $0x28] sm:$0xff] }
  0x28   :  { %v503_v8 = vpack.c.bf16 %v141_v7, %v140_v6  ;;  %v239_v27 = vld [vmem:[#allocation4 + $0x20] sm:$0xff]  ;;  %v338_v48 = vld [vmem:[#allocation4 + $0x30] sm:$0xff]  ;;  %v339_v49 = vld [vmem:[#allocation4 + $0x38] sm:$0xff] }
  0x29   :  { %501 = vmatpush3.bf16.msra.mxu0 %v500_v4  ;;  %v506_v29 = vpack.c.bf16 %v240_v28, %v239_v27  ;;  %v451_v30 = vld [vmem:[%s665_s2 + $0x1] ss:$0 sm:$0xff]  ;;  %v509_v50 = vpack.c.bf16 %v339_v49, %v338_v48  ;;  %v454_v51 = vld [vmem:[%s665_s2 + $0x2] ss:$0 sm:$0xff] }
  0x2a   :  { %505 = vmatprep.subr.bf16.mxu0 %v586_v0  ;;  %504 = vmatpush3.bf16.msra.mxu1 %v503_v8 }
  0x2b   :  { %508 = vmatprep.subr.bf16.mxu1 %v586_v0 }
  0x2c   :  { %476 = vmatmul.mubr.msk.f32.vlgmr.msra.gmra.mrb[0].mxu0 %vm50_vm1, %v40_v5  ;;  %v457_v5 = vld [vmem:[%s665_s2 + $0x3] ss:$0 sm:$0xff] }
  0x2d   :  { %489 = vmatprep.mubr.msk.f32.mxu0 %vm587_vm0, %v588_v1  ;;  %507 = vmatpush3.bf16.msra.mxu0 %v506_v29 }
  0xff   :  { %v120_v10 = vpop.f32.mrb[0].mxu0 }
 0x100   :  { %v121_v11 = vadd.f32 %v448_v9, %v120_v10  ;;  %v477_v12 = vpop.f32.mrb[1].mxu0 }
 0x102   :  { %v125_v13 = vand.u32 2147483647, %v121_v11  ;;  %v124_v24 = vmax.f32 %v121_v11, 0.0 }
 0x104   :  { %v126_v14 = vsub.f32 0.0, %v125_v13 }
 0x106   :  { %v127_v15 = vmul.f32 1.442695, %v126_v14 }
 0x108   :  { %518 = vpow2.f32 %v127_v15  ;;  %v421_v15 = vlaneseq }
 0x112   :  { %v519_v16 = vpop.eup %518 }
 0x113   :  { %v129_v17 = vadd.f32 1.0, %v519_v16  ;;  %v132_v18 = vmul.f32 -0.5, %v519_v16  ;;  %v135_v20 = vand.u32 2147483647, %v519_v16 }
 0x115   :  { %520 = vlog2.f32 %v129_v17  ;;  %v133_v19 = vadd.f32 1.0, %v132_v18  ;;  %vm136_vm2 = vcmp.lt.f32.partialorder %v135_v20, 0.0004427343  ;;  %v422_v18 = vand.u32 127, %v421_v15 }
 0x117   :  { %v134_v23 = vmul.f32 %v519_v16, %v133_v19  ;;  %vm423_vm6 = vcmp.lt.s32.totalorder %v422_v18, 2 }
 0x11f   :  { %v521_v21 = vpop.eup %520 }
 0x120   :  { %v131_v22 = vmul.f32 0.6931472, %v521_v21 }
 0x122   :  { %v137_v25 = vsel %vm136_vm2, %v134_v23, %v131_v22 }
 0x123   :  { %v138_v26 = vadd.f32 %v137_v25, %v124_v24 }
 0x125   :  { %483 = vmatmul.mubr.msk.f32.vlgmr.msra.gmra.mrb[0].mxu1 %vm50_vm1, %v138_v26 }
 0x126   :  { %496 = vmatprep.mubr.msk.f32.mxu1 %vm587_vm0, %v588_v1  ;;  %510 = vmatpush3.bf16.msra.mxu1 %v509_v50 }
 0x1f8   :  { %v219_v31 = vpop.f32.mrb[0].mxu1 }
 0x1f9   :  { %v220_v32 = vadd.f32 %v451_v30, %v219_v31  ;;  %v484_v33 = vpop.f32.mrb[1].mxu1 }
 0x1fb   :  { %v224_v34 = vand.u32 2147483647, %v220_v32  ;;  %v223_v45 = vmax.f32 %v220_v32, 0.0 }
 0x1fd   :  { %v225_v35 = vsub.f32 0.0, %v224_v34 }
 0x1ff   :  { %v226_v36 = vmul.f32 1.442695, %v225_v35 }
 0x201   :  { %522 = vpow2.f32 %v226_v36 }
 0x20b   :  { %v523_v37 = vpop.eup %522 }
 0x20c   :  { %v228_v38 = vadd.f32 1.0, %v523_v37  ;;  %v231_v39 = vmul.f32 -0.5, %v523_v37  ;;  %v234_v41 = vand.u32 2147483647, %v523_v37 }
 0x20e   :  { %524 = vlog2.f32 %v228_v38  ;;  %v232_v40 = vadd.f32 1.0, %v231_v39  ;;  %vm235_vm3 = vcmp.lt.f32.partialorder %v234_v41, 0.0004427343 }
 0x210   :  { %v233_v44 = vmul.f32 %v523_v37, %v232_v40 }
 0x218   :  { %v525_v42 = vpop.eup %524 }
 0x219   :  { %v230_v43 = vmul.f32 0.6931472, %v525_v42 }
 0x21b   :  { %v236_v46 = vsel %vm235_vm3, %v233_v44, %v230_v43 }
 0x21c   :  { %v237_v47 = vadd.f32 %v236_v46, %v223_v45 }
 0x21e   :  { %490 = vmatmul.mubr.msk.f32.vlgmr.msra.gmra.mrb[2].mxu0 %vm50_vm1, %v237_v47 }
 0x2f1   :  { %v318_v52 = vpop.f32.mrb[2].mxu0 }
 0x2f2   :  { %v319_v53 = vadd.f32 %v454_v51, %v318_v52  ;;  %v491_v54 = vpop.f32.mrb[3].mxu0 }
 0x2f4   :  { %v323_v55 = vand.u32 2147483647, %v319_v53  ;;  %v322_v2 = vmax.f32 %v319_v53, 0.0 }
 0x2f6   :  { %v324_v56 = vsub.f32 0.0, %v323_v55 }
 0x2f8   :  { %v325_v57 = vmul.f32 1.442695, %v324_v56 }
 0x2fa   :  { %526 = vpow2.f32 %v325_v57 }
 0x304   :  { %v527_v58 = vpop.eup %526 }
 0x305   :  { %v327_v59 = vadd.f32 1.0, %v527_v58  ;;  %v330_v60 = vmul.f32 -0.5, %v527_v58  ;;  %v333_v62 = vand.u32 2147483647, %v527_v58 }
 0x307   :  { %528 = vlog2.f32 %v327_v59  ;;  %v331_v61 = vadd.f32 1.0, %v330_v60  ;;  %vm334_vm4 = vcmp.lt.f32.partialorder %v333_v62, 0.0004427343 }
 0x309   :  { %v332_v1 = vmul.f32 %v527_v58, %v331_v61 }
 0x311   :  { %v529_v63 = vpop.eup %528 }
 0x312   :  { %v329_v0 = vmul.f32 0.6931472, %v529_v63 }
 0x314   :  { %v335_v3 = vsel %vm334_vm4, %v332_v1, %v329_v0 }
 0x315   :  { %v336_v4 = vadd.f32 %v335_v3, %v322_v2 }
 0x317   :  { %497 = vmatmul.mubr.msk.f32.vlgmr.msra.gmra.mrb[2].mxu1 %vm50_vm1, %v336_v4 }
 0x3ea   :  { %v417_v6 = vpop.f32.mrb[2].mxu1 }
 0x3eb   :  { %v418_v7 = vadd.f32 %v457_v5, %v417_v6  ;;  %v498_v8 = vpop.f32.mrb[3].mxu1 }
 0x3ed   :  { %v425_v9 = vand.u32 2147483647, %v418_v7  ;;  %v424_v22 = vmax.f32 %v418_v7, 0.0 }
 0x3ef   :  { %v426_v10 = vsub.f32 0.0, %v425_v9 }
 0x3f1   :  { %v427_v11 = vmul.f32 1.442695, %v426_v10 }
 0x3f3   :  { %530 = vpow2.f32 %v427_v11 }
 0x3fd   :  { %v531_v12 = vpop.eup %530 }
 0x3fe   :  { %v429_v13 = vadd.f32 1.0, %v531_v12  ;;  %v432_v14 = vmul.f32 -0.5, %v531_v12  ;;  %v435_v17 = vand.u32 2147483647, %v531_v12 }
 0x400   :  { %532 = vlog2.f32 %v429_v13  ;;  %v433_v16 = vadd.f32 1.0, %v432_v14  ;;  %vm436_vm5 = vcmp.lt.f32.partialorder %v435_v17, 0.0004427343 }
 0x402   :  { %v434_v21 = vmul.f32 %v531_v12, %v433_v16 }
 0x40a   :  { %v533_v19 = vpop.eup %532 }
 0x40b   :  { %v431_v20 = vmul.f32 0.6931472, %v533_v19 }
 0x40d   :  { %v437_v23 = vsel %vm436_vm5, %v434_v21, %v431_v20 }
 0x40e   :  { %v438_v24 = vadd.f32 %v437_v23, %v424_v22 }
 0x410   :  { %v439_v25 = vsel %vm423_vm6, %v418_v7, %v438_v24 }
 0x411   :  { %441 = vst.msk [vmem:[%s666_s3] sm:$0xff] %vm440_vm7, %v439_v25 }
 0x412   :  { %446 = vsyncpa [#allocation3], 1 }
 0x413   :  { %447 = vsyncpa [#allocation5], 1 }

</bundles_post_ra>
